<compile_context>
chip_gen: v5e
topology: v5e:2x2
jax: 0.10.0
libtpu: 0.0.40
codegen_flags: <defaults>
</compile_context>

<pallas_src>
import functools

import jax
import jax.numpy as jnp
from jax.experimental import pallas as pl
from jax.experimental.pallas import tpu as pltpu


def _seq_loss_tile_kernel(*refs, weights, max_flow_sq, batch, hw):
    """One grid step = one lane (spatial) tile; the whole prediction sequence is
    reduced here and the per-pixel valid count is rebuilt from the resident gt.

    refs layout:
      refs[0]    valid_ref (B,  T)
      refs[1]    gt_ref    (2B, T)   row = b*2 + c
      refs[2:-1] pred_refs (2B, T)   the N flow predictions, same row layout
      refs[-1]   out_ref   (1, 1)    this tile's partial loss contribution
    """
    valid_ref, gt_ref = refs[0], refs[1]
    pred_refs = refs[2:-1]
    out_ref = refs[-1]

    gt = gt_ref[...].astype(jnp.float32)                        # (2B, T), resident

    # Weighted L1 over the prediction sequence.  Sublane-reduce each (2B, T)
    # tile to (1, T); gamma**k / denom are Python floats baked at trace time.
    d = None
    for w, p_ref in zip(weights, pred_refs):
        s = jnp.sum(jnp.abs(p_ref[...].astype(jnp.float32) - gt),
                    axis=0, keepdims=True)                      # (1, T)
        d = w * s if d is None else d + w * s

    # Per-pixel count of valid batch entries, computed from the already-loaded
    # gt tile (mag**2 < max_flow**2 is equivalent to sqrt(mag2) < max_flow).
    valid = valid_ref[...].astype(jnp.float32)                  # (B, T)
    vsum = None
    for b in range(batch):
        gx = gt[2 * b:2 * b + 1, :]                             # (1, T)
        gy = gt[2 * b + 1:2 * b + 2, :]                         # (1, T)
        mag2 = gx * gx + gy * gy
        ok = jnp.logical_and(valid[b:b + 1, :] >= 0.5, mag2 < max_flow_sq)
        m = jnp.where(ok, 1.0, 0.0)
        vsum = m if vsum is None else vsum + m                  # (1, T)

    # Mask lanes past the end of the image (possibly ragged last tile holds
    # unspecified padding), then one cross-lane reduction for this tile.
    tile = gt.shape[1]
    col = pl.program_id(0) * tile + jax.lax.broadcasted_iota(jnp.int32, (1, tile), 1)
    contrib = jnp.where(col < hw, vsum * d, 0.0)
    out_ref[...] = jnp.sum(contrib, axis=1, keepdims=True)      # (1, 1)


def _pick_tile(hw, n_preds, batch, tile_hw=None):
    """Largest lane-tile keeping all double-buffered blocks within ~12 MiB."""
    rows = batch + 2 * batch * (n_preds + 1)        # valid + gt + N predictions
    bytes_per_lane = 2 * 4 * rows                   # x2 for double buffering
    budget = 12 * 1024 * 1024
    max_lanes = max(128, (budget // bytes_per_lane) // 128 * 128)
    if tile_hw is not None:
        max_lanes = min(max_lanes, max(128, (int(tile_hw) // 128) * 128))
    if hw <= max_lanes:
        return hw                                   # full-width tile (always legal)
    return max_lanes                                # multiple of 128; tail masked


def sequence_loss_pallas(flow_preds, flows, valids, *, gamma=0.8, max_flow=400.0,
                         tile_hw=None):
    """flow_preds: list of [B,2,H,W]; flows: [B,1,2,H,W]; valids: [B,1,1,H,W]."""
    n = len(flow_preds)
    assert n >= 1
    B, C, H, W = flow_preds[0].shape
    assert C == 2
    HW = H * W
    R = 2 * B                                        # flattened (batch, channel) rows

    flow_gt = flows[:, 0]                            # [B, 2, H, W]
    valid = valids[:, 0, 0]                          # [B, H, W]

    # Contiguous reshapes only (free views) -- no transposes, no stacking.
    gt_flat = flow_gt.reshape(R, HW)
    valid_flat = valid.reshape(B, HW).astype(jnp.float32)
    preds_flat = [p.reshape(R, HW) for p in flow_preds]

    T = _pick_tile(HW, n, B, tile_hw)
    num_tiles = pl.cdiv(HW, T)

    # Fold the mean denominator of the broadcast [B, B, 2, H, W] tensor into the
    # per-prediction gamma weights (cross-batch broadcast kept bit-compatible
    # with the PyTorch module on purpose).
    inv_denom = 1.0 / float(B * B * 2 * H * W)
    weights = tuple(float(gamma) ** (n - 1 - i) * inv_denom for i in range(n))

    kernel = functools.partial(
        _seq_loss_tile_kernel, weights=weights,
        max_flow_sq=float(max_flow) ** 2, batch=B, hw=HW)

    big_spec = pl.BlockSpec((R, T), lambda t: (0, t))
    partial_sums = pl.pallas_call(
        kernel,
        out_shape=jax.ShapeDtypeStruct((num_tiles, 1), jnp.float32),
        grid=(num_tiles,),
        in_specs=[pl.BlockSpec((B, T), lambda t: (0, t))]      # valid
                 + [big_spec]                                   # gt
                 + [big_spec] * n,                              # predictions
        out_specs=pl.BlockSpec((1, 1), lambda t: (t, 0)),
        compiler_params=pltpu.CompilerParams(
            dimension_semantics=("parallel",),
            vmem_limit_bytes=32 * 1024 * 1024),
    )(valid_flat, gt_flat, *preds_flat)

    return jnp.sum(partial_sums)


def sequence_loss_ref(flow_preds, flows, valids, *, gamma=0.8, max_flow=400.0):
    """Pure-JAX transcription of the PyTorch forward (for verification)."""
    flow_gt = flows[:, 0]
    valid = valids[:, 0]
    n = len(flow_preds)
    mag = jnp.sqrt(jnp.sum(flow_gt ** 2, axis=1, keepdims=True))
    valid = jnp.logical_and(valid >= 0.5, mag < max_flow)
    loss = jnp.float32(0.0)
    for i in range(n):
        w = gamma ** (n - i - 1)
        i_loss = jnp.abs(flow_preds[i] - flow_gt)
        loss = loss + w * jnp.mean(valid[:, None] * i_loss)
    return loss


if __name__ == "__main__":
    key = jax.random.PRNGKey(0)
    B, H, W, N = 2, 32, 32, 3
    gamma, max_flow = 0.8, 10.0   # small max_flow so the magnitude test is exercised

    k_gt, k_valid, *k_preds = jax.random.split(key, 2 + N)
    flows = 8.0 * jax.random.normal(k_gt, (B, 1, 2, H, W), dtype=jnp.float32)
    valids = jax.random.uniform(k_valid, (B, 1, 1, H, W), dtype=jnp.float32)
    flow_preds = [
        flows[:, 0] + 0.5 * jax.random.normal(k_preds[i], (B, 2, H, W), dtype=jnp.float32)
        for i in range(N)
    ]

    loss_ref = sequence_loss_ref(flow_preds, flows, valids, gamma=gamma, max_flow=max_flow)

    # Default path: tile auto-sized from the VMEM budget (single tile here).
    loss_full = jax.block_until_ready(
        sequence_loss_pallas(flow_preds, flows, valids, gamma=gamma, max_flow=max_flow))
    assert jnp.allclose(loss_full, loss_ref, rtol=1e-4, atol=1e-5), (loss_full, loss_ref)

    # Multi-tile path (4 even spatial tiles) -- exercises the parallel grid.
    loss_tiled = jax.block_until_ready(
        sequence_loss_pallas(flow_preds, flows, valids, gamma=gamma, max_flow=max_flow,
                             tile_hw=256))
    assert jnp.allclose(loss_tiled, loss_ref, rtol=1e-4, atol=1e-5), (loss_tiled, loss_ref)

    # Ragged last tile (1024 lanes split into 384 + 384 + 256) -- exercises the
    # in-kernel lane mask for non-dividing tile sizes.
    loss_ragged = jax.block_until_ready(
        sequence_loss_pallas(flow_preds, flows, valids, gamma=gamma, max_flow=max_flow,
                             tile_hw=384))
    assert jnp.allclose(loss_ragged, loss_ref, rtol=1e-4, atol=1e-5), (loss_ragged, loss_ref)

    print("KERNEL_OK")
</pallas_src>

<mosaic_0001>
module attributes {stable_mosaic.version = 11 : i64} {
  func.func @_seq_loss_tile_kernel(%arg0: i32, %arg1: memref<2x1024xf32, #tpu.memory_space<vmem>>, %arg2: memref<4x1024xf32, #tpu.memory_space<vmem>>, %arg3: memref<4x1024xf32, #tpu.memory_space<vmem>>, %arg4: memref<4x1024xf32, #tpu.memory_space<vmem>>, %arg5: memref<4x1024xf32, #tpu.memory_space<vmem>>, %arg6: memref<1x1xf32, #tpu.memory_space<vmem>>) attributes {dimension_semantics = [#tpu.dimension_semantics<parallel>], iteration_bounds = array<i64: 1>, scalar_prefetch = 0 : i64, scratch_operands = 0 : i64, tpu.core_type = #tpu.core_type<tc>, window_params = [{transform_indices = @transform_0, window_bounds = array<i64: 2, 1024>}, {transform_indices = @transform_1, window_bounds = array<i64: 4, 1024>}, {transform_indices = @transform_2, window_bounds = array<i64: 4, 1024>}, {transform_indices = @transform_3, window_bounds = array<i64: 4, 1024>}, {transform_indices = @transform_4, window_bounds = array<i64: 4, 1024>}, {transform_indices = @transform_5, window_bounds = array<i64: 1, 1>}]} {
    %c0 = arith.constant 0 : index
    %c0_0 = arith.constant 0 : index
    %0 = vector.load %arg2[%c0, %c0_0] : memref<4x1024xf32, #tpu.memory_space<vmem>>, vector<4x1024xf32>
    %c0_1 = arith.constant 0 : index
    %c0_2 = arith.constant 0 : index
    %1 = vector.load %arg3[%c0_1, %c0_2] : memref<4x1024xf32, #tpu.memory_space<vmem>>, vector<4x1024xf32>
    %2 = arith.subf %1, %0 : vector<4x1024xf32>
    %3 = math.absf %2 : vector<4x1024xf32>
    %cst = arith.constant dense<0.000000e+00> : vector<1024xf32>
    %4 = vector.multi_reduction <add>, %3, %cst [0] : vector<4x1024xf32> to vector<1024xf32>
    %5 = vector.shape_cast %4 : vector<1024xf32> to vector<1x1024xf32>
    %cst_3 = arith.constant 7.812500e-05 : f32
    %6 = vector.broadcast %cst_3 : f32 to vector<1x1024xf32>
    %7 = arith.mulf %6, %5 : vector<1x1024xf32>
    %c0_4 = arith.constant 0 : index
    %c0_5 = arith.constant 0 : index
    %8 = vector.load %arg4[%c0_4, %c0_5] : memref<4x1024xf32, #tpu.memory_space<vmem>>, vector<4x1024xf32>
    %9 = arith.subf %8, %0 : vector<4x1024xf32>
    %10 = math.absf %9 : vector<4x1024xf32>
    %cst_6 = arith.constant dense<0.000000e+00> : vector<1024xf32>
    %11 = vector.multi_reduction <add>, %10, %cst_6 [0] : vector<4x1024xf32> to vector<1024xf32>
    %12 = vector.shape_cast %11 : vector<1024xf32> to vector<1x1024xf32>
    %cst_7 = arith.constant 9.76562514E-5 : f32
    %13 = vector.broadcast %cst_7 : f32 to vector<1x1024xf32>
    %14 = arith.mulf %13, %12 : vector<1x1024xf32>
    %15 = arith.addf %7, %14 : vector<1x1024xf32>
    %c0_8 = arith.constant 0 : index
    %c0_9 = arith.constant 0 : index
    %16 = vector.load %arg5[%c0_8, %c0_9] : memref<4x1024xf32, #tpu.memory_space<vmem>>, vector<4x1024xf32>
    %17 = arith.subf %16, %0 : vector<4x1024xf32>
    %18 = math.absf %17 : vector<4x1024xf32>
    %cst_10 = arith.constant dense<0.000000e+00> : vector<1024xf32>
    %19 = vector.multi_reduction <add>, %18, %cst_10 [0] : vector<4x1024xf32> to vector<1024xf32>
    %20 = vector.shape_cast %19 : vector<1024xf32> to vector<1x1024xf32>
    %cst_11 = arith.constant 1.22070313E-4 : f32
    %21 = vector.broadcast %cst_11 : f32 to vector<1x1024xf32>
    %22 = arith.mulf %21, %20 : vector<1x1024xf32>
    %23 = arith.addf %15, %22 : vector<1x1024xf32>
    %c0_12 = arith.constant 0 : index
    %c0_13 = arith.constant 0 : index
    %24 = vector.load %arg1[%c0_12, %c0_13] : memref<2x1024xf32, #tpu.memory_space<vmem>>, vector<2x1024xf32>
    %25 = vector.extract_strided_slice %0 {offsets = [0, 0], sizes = [1, 1024], strides = [1, 1]} : vector<4x1024xf32> to vector<1x1024xf32>
    %26 = vector.extract_strided_slice %0 {offsets = [1, 0], sizes = [1, 1024], strides = [1, 1]} : vector<4x1024xf32> to vector<1x1024xf32>
    %27 = arith.mulf %25, %25 : vector<1x1024xf32>
    %28 = arith.mulf %26, %26 : vector<1x1024xf32>
    %29 = arith.addf %27, %28 : vector<1x1024xf32>
    %30 = vector.extract_strided_slice %24 {offsets = [0, 0], sizes = [1, 1024], strides = [1, 1]} : vector<2x1024xf32> to vector<1x1024xf32>
    %cst_14 = arith.constant 5.000000e-01 : f32
    %31 = vector.broadcast %cst_14 : f32 to vector<1x1024xf32>
    %32 = arith.cmpf oge, %30, %31 : vector<1x1024xf32>
    %cst_15 = arith.constant 1.000000e+02 : f32
    %33 = vector.broadcast %cst_15 : f32 to vector<1x1024xf32>
    %34 = arith.cmpf olt, %29, %33 : vector<1x1024xf32>
    %35 = arith.andi %32, %34 : vector<1x1024xi1>
    %cst_16 = arith.constant 1.000000e+00 : f32
    %cst_17 = arith.constant 0.000000e+00 : f32
    %36 = vector.broadcast %cst_16 : f32 to vector<1x1024xf32>
    %37 = vector.broadcast %cst_17 : f32 to vector<1x1024xf32>
    %38 = arith.select %35, %36, %37 : vector<1x1024xi1>, vector<1x1024xf32>
    %39 = vector.extract_strided_slice %0 {offsets = [2, 0], sizes = [1, 1024], strides = [1, 1]} : vector<4x1024xf32> to vector<1x1024xf32>
    %40 = vector.extract_strided_slice %0 {offsets = [3, 0], sizes = [1, 1024], strides = [1, 1]} : vector<4x1024xf32> to vector<1x1024xf32>
    %41 = arith.mulf %39, %39 : vector<1x1024xf32>
    %42 = arith.mulf %40, %40 : vector<1x1024xf32>
    %43 = arith.addf %41, %42 : vector<1x1024xf32>
    %44 = vector.extract_strided_slice %24 {offsets = [1, 0], sizes = [1, 1024], strides = [1, 1]} : vector<2x1024xf32> to vector<1x1024xf32>
    %cst_18 = arith.constant 5.000000e-01 : f32
    %45 = vector.broadcast %cst_18 : f32 to vector<1x1024xf32>
    %46 = arith.cmpf oge, %44, %45 : vector<1x1024xf32>
    %cst_19 = arith.constant 1.000000e+02 : f32
    %47 = vector.broadcast %cst_19 : f32 to vector<1x1024xf32>
    %48 = arith.cmpf olt, %43, %47 : vector<1x1024xf32>
    %49 = arith.andi %46, %48 : vector<1x1024xi1>
    %cst_20 = arith.constant 1.000000e+00 : f32
    %cst_21 = arith.constant 0.000000e+00 : f32
    %50 = vector.broadcast %cst_20 : f32 to vector<1x1024xf32>
    %51 = vector.broadcast %cst_21 : f32 to vector<1x1024xf32>
    %52 = arith.select %49, %50, %51 : vector<1x1024xi1>, vector<1x1024xf32>
    %53 = arith.addf %38, %52 : vector<1x1024xf32>
    %c1024_i32 = arith.constant 1024 : i32
    %54 = arith.muli %arg0, %c1024_i32 : i32
    %55 = tpu.iota {dimensions = array<i32: 1>} : vector<1x1024xi32>
    %56 = vector.broadcast %54 : i32 to vector<1x1024xi32>
    %57 = arith.addi %56, %55 : vector<1x1024xi32>
    %c1024_i32_22 = arith.constant 1024 : i32
    %58 = vector.broadcast %c1024_i32_22 : i32 to vector<1x1024xi32>
    %59 = arith.cmpi slt, %57, %58 : vector<1x1024xi32>
    %60 = arith.mulf %53, %23 : vector<1x1024xf32>
    %cst_23 = arith.constant 0.000000e+00 : f32
    %61 = vector.broadcast %cst_23 : f32 to vector<1x1024xf32>
    %62 = arith.select %59, %60, %61 : vector<1x1024xi1>, vector<1x1024xf32>
    %cst_24 = arith.constant dense<0.000000e+00> : vector<1xf32>
    %63 = vector.multi_reduction <add>, %62, %cst_24 [1] : vector<1x1024xf32> to vector<1xf32>
    %64 = vector.shape_cast %63 : vector<1xf32> to vector<1x1xf32>
    %c0_25 = arith.constant 0 : index
    %c0_26 = arith.constant 0 : index
    %65 = vector.load %arg6[%c0_25, %c0_26] : memref<1x1xf32, #tpu.memory_space<vmem>>, vector<1x1xf32>
    tpu.vector_store %arg6[%c0_25, %c0_26], %64 {strides = array<i32>} : memref<1x1xf32, #tpu.memory_space<vmem>>, vector<1x1xf32>,
    return
  }
  func.func @transform_0(%arg0: i32) -> (i32, i32) {
    %c0_i32 = arith.constant 0 : i32
    %c0_i32_0 = arith.constant 0 : i32
    return %c0_i32, %arg0 : i32, i32
  }
  func.func @transform_1(%arg0: i32) -> (i32, i32) {
    %c0_i32 = arith.constant 0 : i32
    %c0_i32_0 = arith.constant 0 : i32
    return %c0_i32, %arg0 : i32, i32
  }
  func.func @transform_2(%arg0: i32) -> (i32, i32) {
    %c0_i32 = arith.constant 0 : i32
    %c0_i32_0 = arith.constant 0 : i32
    return %c0_i32, %arg0 : i32, i32
  }
  func.func @transform_3(%arg0: i32) -> (i32, i32) {
    %c0_i32 = arith.constant 0 : i32
    %c0_i32_0 = arith.constant 0 : i32
    return %c0_i32, %arg0 : i32, i32
  }
  func.func @transform_4(%arg0: i32) -> (i32, i32) {
    %c0_i32 = arith.constant 0 : i32
    %c0_i32_0 = arith.constant 0 : i32
    return %c0_i32, %arg0 : i32, i32
  }
  func.func @transform_5(%arg0: i32) -> (i32, i32) {
    %c0_i32 = arith.constant 0 : i32
    %c0_i32_0 = arith.constant 0 : i32
    return %arg0, %c0_i32 : i32, i32
  }
}

</mosaic_0001>

<bundles_post_ra>
// kernel: tpu_custom_call.1
= control target key start
LH: loop header
LB: loop body
LE: loop exit
PB: predicated region body
PF: predicated region fallthrough
CT: control target
= control target key end

     0   :  { %10 = vsyncpa [#allocation3], 0  ;;  %s971_s0 = inlined_call_operand.hbm [shape: f32[2,1024], index: 0, kind: input, shape index: {}]   ;;  %s972_s1 = inlined_call_operand.hbm [shape: f32[4,1024], index: 1, kind: input, shape index: {}]   ;;  %s973_s2 = inlined_call_operand.hbm [shape: f32[4,1024], index: 2, kind: input, shape index: {}]   ;;  %s974_s3 = inlined_call_operand.hbm [shape: f32[4,1024], index: 3, kind: input, shape index: {}]   ;;  %s975_s4 = inlined_call_operand.hbm [shape: f32[4,1024], index: 4, kind: input, shape index: {}]   ;;  %s976_s5 = inlined_call_operand.hbm [shape: f32[1,1], index: 5, kind: output, shape index: {}]  }
   0x1   :  { %11 = vsyncpa [#allocation6], 0 }
   0x2   :  { %12 = vsyncpa [#allocation9], 0  ;;  %s30_s20 = sshll.u32 %s972_s1, 4  ;;  %s31_s20 = int_to_ptr.hbm [resolvable:$true] %s30_s20 }
   0x3   :  { %13 = vsyncpa [#allocation4], 0  ;;  %s783_s21 = smov [#allocation5]   ;;  %s52_s25 = sshll.u32 %s974_s3, 4  ;;  %s53_s25 = int_to_ptr.hbm [resolvable:$true] %s52_s25 }
   0x4   :  { %s32_s22 = sshll.u32 %s783_s21, 4  ;;  %s784_s26 = smov [#allocation8]   ;;  %s33_s22 = int_to_ptr.vmem [resolvable:$true] %s32_s22 }
   0x5   :  { %35 = dma.hbm_to_vmem [thread:$0]  %s31_s20, 512, %s33_s22, [#allocation6]  }
   0x6   :  { %s54_s27 = sshll.u32 %s784_s26, 4  ;;  %s19_s30 = sshll.u32 %s971_s0, 4  ;;  %s55_s27 = int_to_ptr.vmem [resolvable:$true] %s54_s27  ;;  %s20_s30 = int_to_ptr.hbm [resolvable:$true] %s19_s30 }
   0x7   :  { %57 = dma.hbm_to_vmem [thread:$0]  %s53_s25, 512, %s55_s27, [#allocation9]  }
   0x8   :  { %s41_s7 = sshll.u32 %s973_s2, 4  ;;  %s785_s8 = smov [#allocation2]   ;;  %s42_s7 = int_to_ptr.hbm [resolvable:$true] %s41_s7 }
   0x9   :  { %s21_s9 = sshll.u32 %s785_s8, 4  ;;  %s786_s3 = smov [#allocation7]   ;;  %s22_s9 = int_to_ptr.vmem [resolvable:$true] %s21_s9 }
   0xa   :  { %24 = dma.hbm_to_vmem [thread:$0]  %s20_s30, 256, %s22_s9, [#allocation3]  }
   0xb   :  { %s43_s10 = sshll.u32 %s786_s3, 4  ;;  %s63_s13 = sshll.u32 %s975_s4, 4  ;;  %s44_s10 = int_to_ptr.vmem [resolvable:$true] %s43_s10  ;;  %s64_s13 = int_to_ptr.hbm [resolvable:$true] %s63_s13 }
   0xc   :  { %46 = dma.hbm_to_vmem [thread:$0]  %s42_s7, 512, %s44_s10, [#allocation6]  }
   0xd   :  { %s787_s0 = smov [#allocation10]  }
   0xe   :  { %s65_s14 = sshll.u32 %s787_s0, 4  ;;  %s66_s14 = int_to_ptr.vmem [resolvable:$true] %s65_s14 }
   0xf   :  { %68 = dma.hbm_to_vmem [thread:$0]  %s64_s13, 512, %s66_s14, [#allocation9]  }
  0x10   :  { %775 = dma.done.wait [#allocation3], 256  }
  0x11   :  { %776 = vsyncadd [#allocation3], 4294967040 }
  0x12   :  { %777 = dma.done.wait [#allocation6], 1024  }
  0x13   :  { %778 = vsyncadd [#allocation6], 4294966272 }
  0x14   :  { %779 = dma.done.wait [#allocation9], 1024  }
  0x15   :  { %780 = vsyncadd [#allocation9], 4294966272  ;;  %v836_v0 = vld [vmem:[#allocation5] sm:$0xff]  ;;  %v838_v1 = vld [vmem:[#allocation5 + $0x8] sm:$0xff]  ;;  %vm132_vm0 = vcmask 1043456   ;;  %vm461_vm5 = vcmask 1041408  }
  0x16   :  { %v840_v2 = vld [vmem:[#allocation5 + $0x10] sm:$0xff]  ;;  %v842_v3 = vld [vmem:[#allocation5 + $0x18] sm:$0xff]  ;;  %v93_v4 = vld [vmem:[#allocation7] sm:$0xff]  ;;  %vm463_vm6 = vcmask 1045508   ;;  %s790_s2 = smov [#allocation11]   ;;  %s605_s17 = sshll.u32 %s976_s5, 4  ;;  %s606_s17 = int_to_ptr.hbm [resolvable:$true] %s605_s17 }
  0x17   :  { %v94_v5 = vld [vmem:[#allocation7 + $0x8] sm:$0xff]  ;;  %v95_v6 = vld [vmem:[#allocation7 + $0x10] sm:$0xff]  ;;  %v96_v7 = vld [vmem:[#allocation7 + $0x18] sm:$0xff]  ;;  %v97_v8 = vsub.f32 %v93_v4, %v836_v0  ;;  %s603_s4 = sshll.u32 %s790_s2, 4  ;;  %s604_s4 = int_to_ptr.vmem [resolvable:$true] %s603_s4 }
  0x18   :  { %v98_v9 = vsub.f32 %v94_v5, %v838_v1  ;;  %v99_v10 = vsub.f32 %v95_v6, %v840_v2  ;;  %v100_v11 = vsub.f32 %v96_v7, %v842_v3  ;;  %v197_v12 = vld [vmem:[#allocation8] sm:$0xff]  ;;  %v198_v13 = vld [vmem:[#allocation8 + $0x8] sm:$0xff]  ;;  %v199_v16 = vld [vmem:[#allocation8 + $0x10] sm:$0xff] }
  0x19   :  { %v101_v14 = vand.u32 2147483647, %v97_v8  ;;  %v200_v17 = vld [vmem:[#allocation8 + $0x18] sm:$0xff]  ;;  %v308_v20 = vld [vmem:[#allocation10] sm:$0xff]  ;;  %v309_v21 = vld [vmem:[#allocation10 + $0x8] sm:$0xff]  ;;  %v201_v22 = vsub.f32 %v197_v12, %v836_v0  ;;  %v202_v23 = vsub.f32 %v198_v13, %v838_v1  ;;  %v203_v24 = vsub.f32 %v199_v16, %v840_v2 }
  0x1a   :  { %v102_v15 = vand.u32 2147483647, %v98_v9  ;;  %v103_v18 = vand.u32 2147483647, %v99_v10  ;;  %v104_v19 = vand.u32 2147483647, %v100_v11  ;;  %v204_v25 = vsub.f32 %v200_v17, %v842_v3 }
  0x1b   :  { %109 = vst [vmem:[#allocation1] ss:$2 sm:$0xff] %v101_v14  ;;  %v312_v26 = vsub.f32 %v308_v20, %v836_v0  ;;  %v313_v27 = vsub.f32 %v309_v21, %v838_v1  ;;  %v205_v28 = vand.u32 2147483647, %v201_v22  ;;  %v206_v29 = vand.u32 2147483647, %v202_v23 }
  0x1c   :  { %111 = vst [vmem:[#allocation1 + $0x10] ss:$2 sm:$0xff] %v102_v15  ;;  %v207_v30 = vand.u32 2147483647, %v203_v24  ;;  %v208_v31 = vand.u32 2147483647, %v204_v25 }
  0x1d   :  { %113 = vst [vmem:[#allocation1 + $0x20] ss:$2 sm:$0xff] %v103_v18  ;;  %v854_v32 = vld [vmem:[#allocation10 + $0x10] sm:$0xff]  ;;  %v316_v33 = vand.u32 2147483647, %v312_v26  ;;  %v311_v12 = vld [vmem:[#allocation10 + $0x18] sm:$0xff] }
  0x1e   :  { %115 = vst [vmem:[#allocation1 + $0x30] ss:$2 sm:$0xff] %v104_v19  ;;  %v856_v34 = vand.u32 2147483647, %v313_v27  ;;  %v314_v43 = vsub.f32 %v854_v32, %v840_v2  ;;  %v315_v24 = vsub.f32 %v311_v12, %v842_v3 }
  0x20   :  { %v318_v32 = vand.u32 2147483647, %v314_v43 }
  0x22   :  { %v116_v35 = vld.sshfl [vmem:[#allocation1] sm:$0xff pattern:$0x75316420]  ;;  %v117_v36 = vld.sshfl [vmem:[#allocation1 + $0x8] sm:$0xff pattern:$0x75316420] }
  0x23   :  { %v118_v37 = vld.sshfl [vmem:[#allocation1 + $0x10] sm:$0xff pattern:$0x75316420]  ;;  %v119_v38 = vld.sshfl [vmem:[#allocation1 + $0x18] sm:$0xff pattern:$0x75316420] }
  0x24   :  { %v120_v39 = vld.sshfl [vmem:[#allocation1 + $0x20] sm:$0xff pattern:$0x75316420]  ;;  %v121_v40 = vld.sshfl [vmem:[#allocation1 + $0x28] sm:$0xff pattern:$0x75316420] }
  0x25   :  { %v122_v41 = vld.sshfl [vmem:[#allocation1 + $0x30] sm:$0xff pattern:$0x75316420]  ;;  %v123_v42 = vld.sshfl [vmem:[#allocation1 + $0x38] sm:$0xff pattern:$0x75316420] }
  0x26   :  { %v133_v44 = vsel %vm132_vm0, %v116_v35, 0.0  ;;  %v140_v45 = vsel %vm132_vm0, %v117_v36, 0.0  ;;  %v147_v46 = vsel %vm132_vm0, %v118_v37, 0.0  ;;  %v154_v47 = vsel %vm132_vm0, %v119_v38, 0.0  ;;  %213 = vst [vmem:[#allocation1] ss:$2 sm:$0xff] %v205_v28 }
  0x27   :  { %v134_v48 = vrot.slane %v133_v44, 4  ;;  %v141_v49 = vrot.slane %v140_v45, 4  ;;  %v148_v50 = vrot.slane %v147_v46, 4  ;;  %v155_v51 = vrot.slane %v154_v47, 4  ;;  %215 = vst [vmem:[#allocation1 + $0x10] ss:$2 sm:$0xff] %v206_v29 }
  0x28   :  { %v161_v52 = vsel %vm132_vm0, %v120_v39, 0.0  ;;  %v168_v53 = vsel %vm132_vm0, %v121_v40, 0.0  ;;  %v175_v54 = vsel %vm132_vm0, %v122_v41, 0.0  ;;  %v182_v55 = vsel %vm132_vm0, %v123_v42, 0.0  ;;  %217 = vst [vmem:[#allocation1 + $0x20] ss:$2 sm:$0xff] %v207_v30 }
  0x29   :  { %v135_v56 = vadd.f32 %v134_v48, %v133_v44  ;;  %v142_v57 = vadd.f32 %v141_v49, %v140_v45  ;;  %v149_v58 = vadd.f32 %v148_v50, %v147_v46  ;;  %v156_v59 = vadd.f32 %v155_v51, %v154_v47  ;;  %219 = vst [vmem:[#allocation1 + $0x30] ss:$2 sm:$0xff] %v208_v31 }
  0x2a   :  { %v162_v60 = vrot.slane %v161_v52, 4  ;;  %v169_v61 = vrot.slane %v168_v53, 4  ;;  %v176_v62 = vrot.slane %v175_v54, 4  ;;  %v183_v63 = vrot.slane %v182_v55, 4 }
  0x2b   :  { %v136_v4 = vrot.slane %v135_v56, 2  ;;  %v143_v5 = vrot.slane %v142_v57, 2  ;;  %v150_v6 = vrot.slane %v149_v58, 2  ;;  %v157_v7 = vrot.slane %v156_v59, 2 }
  0x2c   :  { %v163_v8 = vadd.f32 %v162_v60, %v161_v52  ;;  %v170_v9 = vadd.f32 %v169_v61, %v168_v53  ;;  %v177_v10 = vadd.f32 %v176_v62, %v175_v54  ;;  %v184_v11 = vadd.f32 %v183_v63, %v182_v55 }
  0x2d   :  { %v137_v13 = vadd.f32 %v136_v4, %v135_v56  ;;  %v144_v14 = vadd.f32 %v143_v5, %v142_v57  ;;  %v151_v15 = vadd.f32 %v150_v6, %v149_v58  ;;  %v158_v16 = vadd.f32 %v157_v7, %v156_v59  ;;  %v220_v17 = vld.sshfl [vmem:[#allocation1] sm:$0xff pattern:$0x75316420]  ;;  %v221_v18 = vld.sshfl [vmem:[#allocation1 + $0x8] sm:$0xff pattern:$0x75316420] }
  0x2e   :  { %v164_v19 = vrot.slane %v163_v8, 2  ;;  %v171_v20 = vrot.slane %v170_v9, 2  ;;  %v178_v21 = vrot.slane %v177_v10, 2  ;;  %v185_v22 = vrot.slane %v184_v11, 2  ;;  %324 = vst [vmem:[#allocation1] ss:$2 sm:$0xff] %v316_v33 }
  0x2f   :  { %v138_v23 = vrot.slane %v137_v13, 1  ;;  %v222_v29 = vld.sshfl [vmem:[#allocation1 + $0x10] sm:$0xff pattern:$0x75316420]  ;;  %v145_v35 = vrot.slane %v144_v14, 1  ;;  %v152_v36 = vrot.slane %v151_v15, 1 }
  0x30   :  { %v165_v25 = vadd.f32 %v164_v19, %v163_v8  ;;  %v172_v26 = vadd.f32 %v171_v20, %v170_v9  ;;  %v179_v27 = vadd.f32 %v178_v21, %v177_v10  ;;  %v186_v28 = vadd.f32 %v185_v22, %v184_v11  ;;  %v223_v30 = vld.sshfl [vmem:[#allocation1 + $0x18] sm:$0xff pattern:$0x75316420]  ;;  %v224_v39 = vld.sshfl [vmem:[#allocation1 + $0x20] sm:$0xff pattern:$0x75316420] }
  0x31   :  { %v139_v31 = vadd.f32 %v138_v23, %v137_v13  ;;  %v159_v37 = vrot.slane %v158_v16, 1  ;;  %326 = vst [vmem:[#allocation1 + $0x10] ss:$2 sm:$0xff] %v856_v34  ;;  %v319_v40 = vand.u32 2147483647, %v315_v24  ;;  %v236_v46 = vsel %vm132_vm0, %v220_v17, 0.0 }
  0x32   :  { %v166_v38 = vrot.slane %v165_v25, 1  ;;  %v173_v33 = vrot.slane %v172_v26, 1  ;;  %v180_v41 = vrot.slane %v179_v27, 1  ;;  %v187_v42 = vrot.slane %v186_v28, 1 }
  0x33   :  { %v225_v44 = vld.sshfl [vmem:[#allocation1 + $0x28] sm:$0xff pattern:$0x75316420]  ;;  %v870_v45 = vmul.f32 7.8125e-05, %v139_v31  ;;  %v243_v47 = vsel %vm132_vm0, %v221_v18, 0.0  ;;  %v146_v48 = vadd.f32 %v145_v35, %v144_v14  ;;  %v153_v49 = vadd.f32 %v152_v36, %v151_v15 }
  0x34   :  { %v250_v43 = vsel %vm132_vm0, %v222_v29, 0.0  ;;  %v160_v50 = vadd.f32 %v159_v37, %v158_v16  ;;  %v226_v51 = vld.sshfl [vmem:[#allocation1 + $0x30] sm:$0xff pattern:$0x75316420]  ;;  %v167_v52 = vadd.f32 %v166_v38, %v165_v25  ;;  %v237_v53 = vrot.slane %v236_v46, 4 }
  0x35   :  { %v227_v34 = vld.sshfl [vmem:[#allocation1 + $0x38] sm:$0xff pattern:$0x75316420]  ;;  %v244_v54 = vrot.slane %v243_v47, 4  ;;  %v251_v55 = vrot.slane %v250_v43, 4  ;;  %v257_v56 = vsel %vm132_vm0, %v223_v30, 0.0  ;;  %v174_v16 = vadd.f32 %v173_v33, %v172_v26 }
  0x36   :  { %v264_v57 = vsel %vm132_vm0, %v224_v39, 0.0  ;;  %v271_v58 = vsel %vm132_vm0, %v225_v44, 0.0  ;;  %v278_v59 = vsel %vm132_vm0, %v226_v51, 0.0  ;;  %328 = vst [vmem:[#allocation1 + $0x20] ss:$2 sm:$0xff] %v318_v32  ;;  %v238_v60 = vadd.f32 %v237_v53, %v236_v46 }
  0x37   :  { %v245_v61 = vadd.f32 %v244_v54, %v243_v47  ;;  %v252_v62 = vadd.f32 %v251_v55, %v250_v43  ;;  %v258_v63 = vrot.slane %v257_v56, 4  ;;  %330 = vst [vmem:[#allocation1 + $0x30] ss:$2 sm:$0xff] %v319_v40  ;;  %v265_v4 = vrot.slane %v264_v57, 4 }
  0x38   :  { %v272_v5 = vrot.slane %v271_v58, 4  ;;  %v279_v6 = vrot.slane %v278_v59, 4  ;;  %v285_v7 = vsel %vm132_vm0, %v227_v34, 0.0  ;;  %v239_v8 = vrot.slane %v238_v60, 2 }
  0x39   :  { %v246_v9 = vrot.slane %v245_v61, 2  ;;  %v253_v10 = vrot.slane %v252_v62, 2  ;;  %v259_v11 = vadd.f32 %v258_v63, %v257_v56  ;;  %v266_v12 = vadd.f32 %v265_v4, %v264_v57  ;;  %v331_v33 = vld.sshfl [vmem:[#allocation1] sm:$0xff pattern:$0x75316420] }
  0x3a   :  { %v273_v13 = vadd.f32 %v272_v5, %v271_v58  ;;  %v280_v14 = vadd.f32 %v279_v6, %v278_v59  ;;  %v286_v15 = vrot.slane %v285_v7, 4  ;;  %v181_v20 = vadd.f32 %v180_v41, %v179_v27  ;;  %v332_v44 = vld.sshfl [vmem:[#allocation1 + $0x8] sm:$0xff pattern:$0x75316420] }
  0x3b   :  { %v247_v17 = vadd.f32 %v246_v9, %v245_v61  ;;  %v254_v18 = vadd.f32 %v253_v10, %v252_v62  ;;  %v260_v19 = vrot.slane %v259_v11, 2  ;;  %v267_v21 = vrot.slane %v266_v12, 2 }
  0x3c   :  { %v274_v22 = vrot.slane %v273_v13, 2  ;;  %v287_v23 = vadd.f32 %v286_v15, %v285_v7  ;;  %v188_v24 = vadd.f32 %v187_v42, %v186_v28  ;;  %v880_v25 = vmul.f32 7.8125e-05, %v146_v48 }
  0x3d   :  { %v882_v29 = vmul.f32 7.8125e-05, %v153_v49  ;;  %v240_v30 = vadd.f32 %v239_v8, %v238_v60  ;;  %v248_v31 = vrot.slane %v247_v17, 1  ;;  %v255_v32 = vrot.slane %v254_v18, 1 }
  0x3e   :  { %v261_v35 = vadd.f32 %v260_v19, %v259_v11  ;;  %v281_v36 = vrot.slane %v280_v14, 2  ;;  %v884_v37 = vmul.f32 7.8125e-05, %v160_v50  ;;  %v886_v26 = vmul.f32 7.8125e-05, %v167_v52 }
  0x3f   :  { %v888_v38 = vmul.f32 7.8125e-05, %v174_v16  ;;  %v890_v27 = vmul.f32 7.8125e-05, %v181_v20  ;;  %v892_v39 = vadd.f32 %v267_v21, %v266_v12  ;;  %v275_v28 = vadd.f32 %v274_v22, %v273_v13 }
  0x40   :  { %v288_v40 = vrot.slane %v287_v23, 2  ;;  %v894_v41 = vmul.f32 7.8125e-05, %v188_v24  ;;  %v241_v42 = vrot.slane %v240_v30, 1  ;;  %v249_v46 = vadd.f32 %v248_v31, %v247_v17 }
  0x41   :  { %v256_v47 = vadd.f32 %v255_v32, %v254_v18  ;;  %v262_v43 = vrot.slane %v261_v35, 1  ;;  %v282_v48 = vadd.f32 %v281_v36, %v280_v14  ;;  %v333_v49 = vld.sshfl [vmem:[#allocation1 + $0x10] sm:$0xff pattern:$0x75316420]  ;;  %v898_v34 = vmul.f32 %v836_v0, %v836_v0 }
  0x42   :  { %v334_v50 = vld.sshfl [vmem:[#allocation1 + $0x18] sm:$0xff pattern:$0x75316420]  ;;  %v335_v51 = vld.sshfl [vmem:[#allocation1 + $0x20] sm:$0xff pattern:$0x75316420]  ;;  %v902_v52 = vmul.f32 %v838_v1, %v838_v1  ;;  %v289_v55 = vadd.f32 %v288_v40, %v287_v23  ;;  %v907_v57 = vmul.f32 %v840_v2, %v840_v2  ;;  %v242_v58 = vadd.f32 %v241_v42, %v240_v30 }
  0x43   :  { %v269_v53 = vrot.slane %v892_v39, 1  ;;  %v276_v54 = vrot.slane %v275_v28, 1  ;;  %v336_v56 = vld.sshfl [vmem:[#allocation1 + $0x28] sm:$0xff pattern:$0x75316420]  ;;  %v347_v61 = vsel %vm132_vm0, %v331_v33, 0.0  ;;  %v263_v1 = vadd.f32 %v262_v43, %v261_v35 }
  0x44   :  { %v337_v59 = vld.sshfl [vmem:[#allocation1 + $0x30] sm:$0xff pattern:$0x75316420]  ;;  %v338_v60 = vld.sshfl [vmem:[#allocation1 + $0x38] sm:$0xff pattern:$0x75316420] }
  0x45   :  { %v354_v0 = vsel %vm132_vm0, %v332_v44, 0.0  ;;  %v361_v62 = vsel %vm132_vm0, %v333_v49, 0.0  ;;  %v283_v63 = vrot.slane %v282_v48, 1  ;;  %v293_v4 = vmul.f32 9.765625e-05, %v249_v46 }
  0x46   :  { %v294_v5 = vmul.f32 9.765625e-05, %v256_v47  ;;  %v348_v6 = vrot.slane %v347_v61, 4  ;;  %v355_v7 = vrot.slane %v354_v0, 4  ;;  %v362_v8 = vrot.slane %v361_v62, 4 }
  0x47   :  { %v368_v9 = vsel %vm132_vm0, %v334_v50, 0.0  ;;  %v290_v2 = vrot.slane %v289_v55, 1  ;;  %v375_v11 = vsel %vm132_vm0, %v335_v51, 0.0  ;;  %v382_v12 = vsel %vm132_vm0, %v336_v56, 0.0 }
  0x48   :  { %v369_v10 = vrot.slane %v368_v9, 4  ;;  %v349_v13 = vadd.f32 %v348_v6, %v347_v61  ;;  %v356_v14 = vadd.f32 %v355_v7, %v354_v0  ;;  %v363_v15 = vadd.f32 %v362_v8, %v361_v62 }
  0x49   :  { %v376_v16 = vrot.slane %v375_v11, 4  ;;  %v383_v18 = vrot.slane %v382_v12, 4  ;;  %v389_v19 = vsel %vm132_vm0, %v337_v59, 0.0  ;;  %v396_v20 = vsel %vm132_vm0, %v338_v60, 0.0 }
  0x4a   :  { %v370_v17 = vadd.f32 %v369_v10, %v368_v9  ;;  %v350_v21 = vrot.slane %v349_v13, 2  ;;  %v357_v22 = vrot.slane %v356_v14, 2  ;;  %v364_v23 = vrot.slane %v363_v15, 2 }
  0x4b   :  { %v377_v24 = vadd.f32 %v376_v16, %v375_v11  ;;  %v384_v31 = vadd.f32 %v383_v18, %v382_v12  ;;  %v390_v32 = vrot.slane %v389_v19, 4  ;;  %v397_v35 = vrot.slane %v396_v20, 4 }
  0x4c   :  { %v371_v30 = vrot.slane %v370_v17, 2  ;;  %v277_v36 = vadd.f32 %v276_v54, %v275_v28  ;;  %v284_v40 = vadd.f32 %v283_v63, %v282_v48  ;;  %v358_v33 = vadd.f32 %v357_v22, %v356_v14 }
  0x4d   :  { %v378_v42 = vrot.slane %v377_v24, 2  ;;  %v291_v44 = vadd.f32 %v290_v2, %v289_v55  ;;  %v385_v46 = vrot.slane %v384_v31, 2  ;;  %v391_v47 = vadd.f32 %v390_v32, %v389_v19 }
  0x4e   :  { %v398_v43 = vadd.f32 %v397_v35, %v396_v20  ;;  %v270_v49 = vadd.f32 %v269_v53, %v892_v39  ;;  %v295_v50 = vmul.f32 9.765625e-05, %v263_v1  ;;  %v351_v51 = vadd.f32 %v350_v21, %v349_v13 }
  0x4f   :  { %v365_v56 = vadd.f32 %v364_v23, %v363_v15  ;;  %v372_v59 = vadd.f32 %v371_v30, %v370_v17  ;;  %v379_v60 = vadd.f32 %v378_v42, %v377_v24  ;;  %v392_v61 = vrot.slane %v391_v47, 2 }
  0x50   :  { %v399_v0 = vrot.slane %v398_v43, 2  ;;  %v297_v62 = vmul.f32 9.765625e-05, %v277_v36  ;;  %v298_v6 = vmul.f32 9.765625e-05, %v284_v40  ;;  %v359_v7 = vrot.slane %v358_v33, 1 }
  0x51   :  { %v424_v28 = vmul.f32 %v842_v3, %v842_v3  ;;  %v299_v48 = vmul.f32 9.765625e-05, %v291_v44  ;;  %v386_v54 = vadd.f32 %v385_v46, %v384_v31  ;;  %v393_v55 = vadd.f32 %v392_v61, %v391_v47 }
  0x52   :  { %v400_v63 = vadd.f32 %v399_v0, %v398_v43  ;;  %v920_v8 = vmul.f32 9.765625e-05, %v242_v58  ;;  %v923_v39 = vadd.f32 %v293_v4, %v880_v25  ;;  %v926_v53 = vadd.f32 %v294_v5, %v882_v29 }
  0x53   :  { %v352_v1 = vrot.slane %v351_v51, 1  ;;  %v928_v9 = vmul.f32 9.765625e-05, %v270_v49  ;;  %v366_v2 = vrot.slane %v365_v56, 1  ;;  %v373_v10 = vrot.slane %v372_v59, 1 }
  0x54   :  { %v380_v11 = vrot.slane %v379_v60, 1  ;;  %v303_v3 = vadd.f32 %v295_v50, %v884_v37  ;;  %v305_v12 = vadd.f32 %v297_v62, %v888_v38  ;;  %v306_v13 = vadd.f32 %v298_v6, %v890_v27 }
  0x55   :  { %v360_v58 = vadd.f32 %v359_v7, %v358_v33  ;;  %v307_v14 = vadd.f32 %v299_v48, %v894_v41  ;;  %v387_v25 = vrot.slane %v386_v54, 1  ;;  %v394_v4 = vrot.slane %v393_v55, 1 }
  0x56   :  { %v401_v15 = vrot.slane %v400_v63, 1  ;;  %v353_v29 = vadd.f32 %v352_v1, %v351_v51  ;;  %v617_v5 = vrot.slane %v898_v34, 9  ;;  %v618_v16 = vrot.slane %v902_v52, 9 }
  0x57   :  { %v619_v17 = vrot.slane %v907_v57, 9  ;;  %v367_v18 = vadd.f32 %v366_v2, %v365_v56  ;;  %v374_v19 = vadd.f32 %v373_v10, %v372_v59  ;;  %v381_v37 = vadd.f32 %v380_v11, %v379_v60  ;;  %v419_v10 = vld [vmem:[#allocation2] sm:$0xff]  ;;  %v420_v11 = vld [vmem:[#allocation2 + $0x8] sm:$0xff] }
  0x58   :  { %v620_v20 = vrot.slane %v424_v28, 9  ;;  %v404_v38 = vmul.f32 0.00012207031, %v360_v58  ;;  %v441_v27 = vadd.f32 %v617_v5, %v898_v34  ;;  %v442_v21 = vadd.f32 %v618_v16, %v902_v52 }
  0x59   :  { %v443_v41 = vadd.f32 %v619_v17, %v907_v57  ;;  %v388_v22 = vadd.f32 %v387_v25, %v386_v54  ;;  %v395_v23 = vadd.f32 %v394_v4, %v393_v55  ;;  %v402_v24 = vadd.f32 %v401_v15, %v400_v63 }
  0x5a   :  { %v444_v30 = vadd.f32 %v620_v20, %v424_v28  ;;  %vm447_vm1 = vcmp.lt.f32.partialorder %v441_v27, 100.0  ;;  %vm448_vm2 = vcmp.lt.f32.partialorder %v442_v21, 100.0  ;;  %v788_v31 = vmov 0  }
  0x5b   :  { %vm449_vm3 = vcmp.lt.f32.partialorder %v443_v41, 100.0  ;;  %v451_v32 = vsel %vm447_vm1, 1, %v788_v31  ;;  %v452_v35 = vsel %vm448_vm2, 1, %v788_v31  ;;  %v405_v57 = vmul.f32 0.00012207031, %v367_v18 }
  0x5c   :  { %vm450_vm4 = vcmp.lt.f32.partialorder %v444_v30, 100.0  ;;  %v453_v36 = vsel %vm449_vm3, 1, %v788_v31  ;;  %v455_v33 = vrot.slane %v451_v32, 2  ;;  %v456_v42 = vrot.slane %v452_v35, 4 }
  0x5d   :  { %v454_v40 = vsel %vm450_vm4, 1, %v788_v31  ;;  %v457_v34 = vrot.slane %v452_v35, 6  ;;  %v458_v44 = vrot.slane %v453_v36, 2  ;;  %v406_v47 = vmul.f32 0.00012207031, %v374_v19 }
  0x5e   :  { %v459_v52 = vrot.slane %v454_v40, 4  ;;  %v460_v46 = vrot.slane %v454_v40, 6  ;;  %v462_v43 = vsel %vm461_vm5, %v451_v32, %v455_v33  ;;  %475 = vst.sshfl [vmem:[#allocation1] sm:$0xff pattern:$0x75643120] %v451_v32  ;;  %v408_v49 = vmul.f32 0.00012207031, %v388_v22 }
  0x5f   :  { %v464_v50 = vsel %vm463_vm6, %v456_v42, %v457_v34  ;;  %v466_v51 = vsel %vm461_vm5, %v453_v36, %v458_v44  ;;  %476 = vst.sshfl [vmem:[#allocation1 + $0x8] sm:$0xff pattern:$0x75643120] %v452_v35  ;;  %v409_v59 = vmul.f32 0.00012207031, %v395_v23  ;;  %v410_v60 = vmul.f32 0.00012207031, %v402_v24 }
  0x60   :  { %v467_v56 = vsel %vm463_vm6, %v459_v52, %v460_v46  ;;  %v465_v61 = vsel %vm132_vm0, %v462_v43, %v464_v50  ;;  %477 = vst.sshfl [vmem:[#allocation1 + $0x10] sm:$0xff pattern:$0x75643120] %v453_v36  ;;  %v300_v62 = vadd.f32 %v920_v8, %v870_v45  ;;  %v403_v6 = vmul.f32 0.00012207031, %v353_v29 }
  0x61   :  { %v468_v0 = vsel %vm132_vm0, %v466_v51, %v467_v56  ;;  %478 = vst.sshfl [vmem:[#allocation1 + $0x18] sm:$0xff pattern:$0x75643120] %v454_v40  ;;  %v412_v7 = vadd.f32 %v404_v38, %v923_v39  ;;  %v413_v28 = vadd.f32 %v405_v57, %v926_v53  ;;  %v414_v48 = vadd.f32 %v406_v47, %v303_v3 }
  0x62   :  { %v304_v54 = vadd.f32 %v928_v9, %v886_v26  ;;  %v407_v55 = vmul.f32 0.00012207031, %v381_v37  ;;  %v416_v63 = vadd.f32 %v408_v49, %v305_v12  ;;  %v417_v1 = vadd.f32 %v409_v59, %v306_v13 }
  0x63   :  { %v418_v2 = vadd.f32 %v410_v60, %v307_v14  ;;  %v411_v58 = vadd.f32 %v403_v6, %v300_v62  ;;  %vm469_vm7 = vcmp.ne.s32.totalorder %v465_v61, 0  ;;  %vm470_vm8 = vcmp.ne.s32.totalorder %v468_v0, 0 }
  0x64   :  { %v536_v8 = vrot.slane %v412_v7, 6  ;;  %v537_v25 = vrot.slane %v413_v28, 4  ;;  %v538_v4 = vrot.slane %v414_v48, 2  ;;  %v415_v39 = vadd.f32 %v407_v55, %v304_v54 }
  0x65   :  { %vm445_vm9 = vcmp.ge.f32.partialorder %v419_v10, 0.5  ;;  %vm446_vm10 = vcmp.ge.f32.partialorder %v420_v11, 0.5  ;;  %v539_v26 = vrot.slane %v416_v63, 6  ;;  %v540_v9 = vrot.slane %v417_v1, 4 }
  0x66   :  { %v480_v45 = vld [vmem:[#allocation1 + $0x1] ss:$2 sm:$0xff]  ;;  %vm471_vm11 = vmand %vm445_vm9, %vm469_vm7  ;;  %v541_v12 = vrot.slane %v418_v2, 2  ;;  %v542_v14 = vsel %vm461_vm5, %v411_v58, %v536_v8  ;;  %v543_v15 = vsel %vm463_vm6, %v537_v25, %v538_v4  ;;  %v789_v29 = vmov 0.0  }
  0x67   :  { %v483_v53 = vrot.slane %v480_v45, 7  ;;  %vm472_vm12 = vmand %vm446_vm10, %vm470_vm8  ;;  %v473_v5 = vsel %vm471_vm11, 1.0, %v789_v29  ;;  %v545_v18 = vsel %vm461_vm5, %v415_v39, %v539_v26  ;;  %v544_v38 = vsel %vm132_vm0, %v542_v14, %v543_v15 }
  0x68   :  { %v482_v3 = vld [vmem:[#allocation1 + $0x11] ss:$2 sm:$0xff]  ;;  %v546_v19 = vsel %vm463_vm6, %v540_v9, %v541_v12  ;;  %v474_v37 = vsel %vm472_vm12, 1.0, %v789_v29  ;;  %vm578_vm2 = vcmask 1040384  }
  0x69   :  { %v484_v13 = vrot.slane %v482_v3, 7  ;;  %vm485_vm13 = vcmp.ne.s32.totalorder %v483_v53, 0  ;;  %v547_v41 = vsel %vm132_vm0, %v545_v18, %v546_v19  ;;  %vm596_vm0 = vcmask 0  }
  0x6a   :  { %vm487_vm14 = vmand %vm445_vm9, %vm485_vm13 }
  0x6b   :  { %vm486_vm15 = vcmp.ne.s32.totalorder %v484_v13, 0  ;;  %v489_v16 = vsel %vm487_vm14, 1.0, %v789_v29 }
  0x6c   :  { %vm488_vm1 = vmand %vm446_vm10, %vm486_vm15  ;;  %v621_v17 = vrot.slane %v489_v16, 9 }
  0x6d   :  { %v490_v20 = vsel %vm488_vm1, 1.0, %v789_v29 }
  0x6e   :  { %v622_v27 = vrot.slane %v490_v20, 9  ;;  %v499_v21 = vadd.f32 %v621_v17, %v473_v5 }
  0x70   :  { %v500_v22 = vadd.f32 %v622_v27, %v474_v37  ;;  %v550_v23 = vmul.f32 %v544_v38, %v499_v21 }
  0x72   :  { %v551_v24 = vmul.f32 %v547_v41, %v500_v22  ;;  %v554_v30 = vperm.slane %v550_v23, 0  ;;  %v555_v31 = vperm.slane %v550_v23, 2  ;;  %v556_v32 = vperm.slane %v550_v23, 4 }
  0x73   :  { %v557_v35 = vperm.slane %v550_v23, 6 }
  0x74   :  { %v558_v36 = vperm.slane %v551_v24, 0  ;;  %v579_v40 = vsel %vm578_vm2, %v554_v30, 0.0  ;;  %v580_v33 = vsel %vm578_vm2, %v555_v31, 0.0  ;;  %v582_v42 = vsel %vm578_vm2, %v556_v32, 0.0 }
  0x75   :  { %v581_v34 = vadd.f32 %v580_v33, %v579_v40  ;;  %v559_v44 = vperm.slane %v551_v24, 2  ;;  %v584_v52 = vsel %vm578_vm2, %v557_v35, 0.0  ;;  %v560_v57 = vperm.slane %v551_v24, 4 }
  0x76   :  { %v586_v47 = vsel %vm578_vm2, %v558_v36, 0.0  ;;  %v561_v49 = vperm.slane %v551_v24, 6 }
  0x77   :  { %v583_v46 = vadd.f32 %v582_v42, %v581_v34  ;;  %v588_v50 = vsel %vm578_vm2, %v559_v44, 0.0  ;;  %v590_v56 = vsel %vm578_vm2, %v560_v57, 0.0 }
  0x78   :  { %v592_v60 = vsel %vm578_vm2, %v561_v49, 0.0 }
  0x79   :  { %v585_v43 = vadd.f32 %v584_v52, %v583_v46 }
  0x7b   :  { %v587_v51 = vadd.f32 %v586_v47, %v585_v43 }
  0x7d   :  { %v589_v59 = vadd.f32 %v588_v50, %v587_v51 }
  0x7f   :  { %v591_v61 = vadd.f32 %v590_v56, %v589_v59 }
  0x81   :  { %v593_v0 = vadd.f32 %v592_v60, %v591_v61 }
  0x83   :  { %594 = vadd.xlane.f32.xlu0 %v593_v0 }
  0xf6   :  { %v595_v62 = vpop.xlane.xlu0 %594 }
  0xf7   :  { %597 = vst.msk [vmem:[#allocation11] sm:$0x1] %vm596_vm0, %v595_v62 }
  0xf8   :  { %608 = dma.vmem_to_hbm [thread:$0]  %s604_s4, 16, %s606_s17, [#allocation4]  }
  0xf9   :  { %781 = dma.done.wait [#allocation4], 16  }
  0xfa   :  { %782 = vsyncadd [#allocation4], 4294967280 }
  0xfb   :  { %613 = vsyncpa [#allocation3], 1 }
  0xfc   :  { %614 = vsyncpa [#allocation6], 1 }
  0xfd   :  { %615 = vsyncpa [#allocation9], 1 }
  0xfe   :  { %616 = vsyncpa [#allocation4], 1 }

</bundles_post_ra>
